<compile_context>
chip_gen: v5e
topology: v5e:2x2
jax: 0.10.0
libtpu: 0.0.40
codegen_flags: <defaults>
</compile_context>

<pallas_src>
import math

import jax
import jax.numpy as jnp
from jax.experimental import pallas as pl
from jax.experimental.pallas import tpu as pltpu

BN_EPS = 1e-5
LANE = 128


def _round_up(x, m):
    return (x + m - 1) // m * m


def _pad_axis(x, axis, target):
    """Zero-pad `axis` of x up to length `target` (no-op if already there)."""
    cur = x.shape[axis]
    if cur == target:
        return x
    pads = [(0, 0)] * x.ndim
    pads[axis] = (0, target - cur)
    return jnp.pad(x, pads)


def _vmem_limit_bytes(TB, S, Dp, FFp, Cp):
    """Explicit scoped-VMEM budget from the actual buffer plan (+headroom)."""
    f32, bf16 = 4, 2
    est = TB * S * Dp * f32                           # resident node state
    est += 2 * 2 * Dp * Dp * bf16                     # W_U + W_V streams (double-buffered)
    est += 2 * 3 * Dp * f32                           # packed per-layer params (double-buffered)
    est += 2 * (FFp + FFp + Cp) * f32                 # head biases (double-buffered)
    est += (Dp * FFp + FFp * FFp + FFp * Cp) * bf16   # head weights (single-buffered scratch)
    est += 2 * TB * Cp * f32                          # logits block
    # 2x headroom + 4 MiB slack; floor 16 MiB, cap 48 MiB (fits v7x's 64 MiB).
    return int(min(max(2 * est + (4 << 20), 16 << 20), 48 << 20))


# ----------------------------------------------------------------------------
# Fused kernel: all GCN layers + graph readout + MLP classifier head.
# grid = (batch_tiles, n_layers); node-feature state lives in VMEM scratch and
# is re-seeded from HBM once per batch tile.
# ----------------------------------------------------------------------------
def gcn_classifier_kernel(h_hbm, wu_ref, wv_ref, lp_ref,
                          w1_hbm, b1_ref, w2_hbm, b2_ref, w3_hbm, b3_ref,
                          o_ref,
                          state_ref, w1_buf, w2_buf, w3_buf, dma_sem):
    bi = pl.program_id(0)
    layer = pl.program_id(1)
    last = pl.num_programs(1) - 1

    TBS, Dp = state_ref.shape          # TBS = TB * S (2-D lane/sublane-dense state)
    TB = o_ref.shape[1]
    S = TBS // TB

    @pl.when(layer == 0)
    def _():
        # Prefetch classifier-head weights (single VMEM copy, DMA hidden behind
        # the L GCN layers; waited only in the layer==last branch).
        pltpu.make_async_copy(w1_hbm, w1_buf, dma_sem.at[1]).start()
        pltpu.make_async_copy(w2_hbm, w2_buf, dma_sem.at[2]).start()
        pltpu.make_async_copy(w3_hbm, w3_buf, dma_sem.at[3]).start()
        # Seed the resident node-feature state for this batch tile from HBM.
        seed = pltpu.make_async_copy(h_hbm.at[bi], state_ref, dma_sem.at[0])
        seed.start()
        seed.wait()

    x2 = state_ref[...]                                        # (TBS, Dp) f32
    # ---- NodeFeatures (mask=None) ----
    # Ux: one lane/sublane-dense (TBS, Dp) @ (Dp, Dp) MXU matmul (bf16 in, f32 acc).
    ux = jnp.dot(x2.astype(jnp.bfloat16), wu_ref[0],
                 preferred_element_type=jnp.float32)           # (TBS, Dp)

    # V branch via linearity: sum_n(x @ Wv + bv) == (sum_n x) @ Wv + S*bv.
    x3 = x2.reshape(TB, S, Dp)
    xsum = jnp.sum(x3, axis=1)                                 # (TB, Dp) f32
    vsum = jnp.dot(xsum.astype(jnp.bfloat16), wv_ref[0],
                   preferred_element_type=jnp.float32)         # (TB, Dp)

    # Packed per-layer params:  row 0 = b_U + S*b_V,  row 1 = BN scale,  row 2 = BN shift.
    lp = lp_ref[0]                                             # (3, Dp) f32
    bias = lp[0:1, :].reshape(1, 1, Dp)
    scale = lp[1:2, :].reshape(1, 1, Dp)
    shift = lp[2:3, :].reshape(1, 1, Dp)

    # ReLU + (dropout = identity) + SkipConnection + BatchNorm1d (eval, folded).
    x_new = jnp.maximum(ux.reshape(TB, S, Dp) + vsum[:, None, :] + bias, 0.0)
    h_new = (x3 + x_new) * scale + shift                       # (TB, S, Dp)
    state_ref[...] = h_new.reshape(TBS, Dp)

    # ---- Graph readout + 3-layer MLP classifier, fused into the last step ----
    # NOTE: o_ref is written only here; this is correct because the output
    # index_map is constant along the layer axis (writeback at tile end).
    @pl.when(layer == last)
    def _():
        pltpu.make_async_copy(w1_hbm, w1_buf, dma_sem.at[1]).wait()
        pltpu.make_async_copy(w2_hbm, w2_buf, dma_sem.at[2]).wait()
        pltpu.make_async_copy(w3_hbm, w3_buf, dma_sem.at[3]).wait()
        g = jnp.sum(h_new, axis=1).astype(jnp.bfloat16)        # (TB, Dp)
        z = jnp.maximum(
            jnp.dot(g, w1_buf[...], preferred_element_type=jnp.float32)
            + b1_ref[...], 0.0)
        z = jnp.maximum(
            jnp.dot(z.astype(jnp.bfloat16), w2_buf[...],
                    preferred_element_type=jnp.float32) + b2_ref[...], 0.0)
        o_ref[0] = (jnp.dot(z.astype(jnp.bfloat16), w3_buf[...],
                            preferred_element_type=jnp.float32) + b3_ref[...])


def run_fused(h3, wu, wv, lparams, w1, b1, w2, b2, w3, b3, *, batch_tile):
    NB, TBS, Dp = h3.shape
    L = wu.shape[0]
    FFp = w1.shape[1]
    Cp = w3.shape[1]
    TB = batch_tile
    S = TBS // TB
    return pl.pallas_call(
        gcn_classifier_kernel,
        out_shape=jax.ShapeDtypeStruct((NB, TB, Cp), jnp.float32),
        grid_spec=pltpu.PrefetchScalarGridSpec(
            num_scalar_prefetch=0,
            grid=(NB, L),
            in_specs=[
                pl.BlockSpec(memory_space=pl.ANY),                   # embedded h (HBM)
                pl.BlockSpec((1, Dp, Dp), lambda b, l: (l, 0, 0)),   # W_U (bf16 / layer)
                pl.BlockSpec((1, Dp, Dp), lambda b, l: (l, 0, 0)),   # W_V (bf16 / layer)
                pl.BlockSpec((1, 3, Dp), lambda b, l: (l, 0, 0)),    # packed bias/scale/shift
                pl.BlockSpec(memory_space=pl.ANY),                   # classifier W1 (HBM)
                pl.BlockSpec((1, FFp), lambda b, l: (0, 0)),         # b1
                pl.BlockSpec(memory_space=pl.ANY),                   # classifier W2 (HBM)
                pl.BlockSpec((1, FFp), lambda b, l: (0, 0)),         # b2
                pl.BlockSpec(memory_space=pl.ANY),                   # classifier W3 (HBM)
                pl.BlockSpec((1, Cp), lambda b, l: (0, 0)),          # b3
            ],
            out_specs=pl.BlockSpec((1, TB, Cp), lambda b, l: (b, 0, 0)),
            scratch_shapes=[
                pltpu.VMEM((TBS, Dp), jnp.float32),     # resident node state (2-D)
                pltpu.VMEM((Dp, FFp), jnp.bfloat16),    # W1 (single-buffered)
                pltpu.VMEM((FFp, FFp), jnp.bfloat16),   # W2 (single-buffered)
                pltpu.VMEM((FFp, Cp), jnp.bfloat16),    # W3 (single-buffered)
                pltpu.SemaphoreType.DMA((4,)),          # 0: state seed, 1-3: head weights
            ]),
        compiler_params=pltpu.CompilerParams(
            dimension_semantics=("parallel", "arbitrary"),
            vmem_limit_bytes=_vmem_limit_bytes(TB, S, Dp, FFp, Cp)),
    )(h3, wu, wv, lparams, w1, b1, w2, b2, w3, b3)


# ----------------------------------------------------------------------------
# Full model wrapper (embedding/concat glue + host-side folding/padding).
# ----------------------------------------------------------------------------
def graph_conv_net_classifier(coord, flag, pos, params, batch_tile=None):
    # Encoder input embedding (tiny matmul + gathers -> glue JAX).
    h = jnp.concatenate(
        [coord @ params["wc"],                 # coord_embed (no bias)
         params["emb"][flag],                  # feat_embed(flag)
         params["emb"][pos]],                  # feat_embed(pos)
        axis=2).astype(jnp.float32)
    B, S, D = h.shape
    FF = params["w1"].shape[1]
    C = params["w3"].shape[1]

    if batch_tile is None:
        batch_tile = B
    assert B % batch_tile == 0, "batch must be divisible by batch_tile"
    NB = B // batch_tile

    Dp = _round_up(D, LANE)
    FFp = _round_up(FF, LANE)
    Cp = _round_up(C, LANE)

    # Fold BatchNorm eval stats and the V-branch bias on host, pack per-layer
    # vectors into one (L, 3, Dp) tensor (single DMA per layer).
    scale = params["gamma"] / jnp.sqrt(params["running_var"] + BN_EPS)
    shift = params["beta"] - params["running_mean"] * scale
    b_comb = params["bu"] + S * params["bv"]              # b_U + num_nodes * b_V
    lparams = _pad_axis(jnp.concatenate([b_comb, scale, shift], axis=1), 2, Dp)

    # Lane-pad to multiples of 128 (exact: zero rows/cols contribute nothing).
    # h is handed to the kernel as (num_batch_tiles, TB*S, Dp) in HBM.
    h_p = _pad_axis(h, 2, Dp).reshape(NB, batch_tile * S, Dp)
    wu_p = _pad_axis(_pad_axis(params["wu"], 1, Dp), 2, Dp).astype(jnp.bfloat16)
    wv_p = _pad_axis(_pad_axis(params["wv"], 1, Dp), 2, Dp).astype(jnp.bfloat16)
    w1_p = _pad_axis(_pad_axis(params["w1"], 0, Dp), 1, FFp).astype(jnp.bfloat16)
    b1_p = _pad_axis(params["b1"], 1, FFp)
    w2_p = _pad_axis(_pad_axis(params["w2"], 0, FFp), 1, FFp).astype(jnp.bfloat16)
    b2_p = _pad_axis(params["b2"], 1, FFp)
    w3_p = _pad_axis(_pad_axis(params["w3"], 0, FFp), 1, Cp).astype(jnp.bfloat16)
    b3_p = _pad_axis(params["b3"], 1, Cp)

    logits_p = run_fused(h_p, wu_p, wv_p, lparams,
                         w1_p, b1_p, w2_p, b2_p, w3_p, b3_p,
                         batch_tile=batch_tile)
    return logits_p.reshape(B, Cp)[:, :C]


# ----------------------------------------------------------------------------
# References for correctness.
# ----------------------------------------------------------------------------
def reference_forward_f32(coord, flag, pos, params):
    """Pure-JAX f32 reference following the original PyTorch math."""
    h = jnp.concatenate(
        [coord @ params["wc"], params["emb"][flag], params["emb"][pos]], axis=2)
    L = params["wu"].shape[0]
    scale = params["gamma"] / jnp.sqrt(params["running_var"] + BN_EPS)
    shift = params["beta"] - params["running_mean"] * scale
    for l in range(L):
        x = h
        ux = x @ params["wu"][l] + params["bu"][l, 0]
        vx = x @ params["wv"][l] + params["bv"][l, 0]
        x_new = jax.nn.relu(ux + vx.sum(axis=1, keepdims=True))
        h = (x + x_new) * scale[l, 0] + shift[l, 0]
    g = h.sum(axis=1)
    z = jax.nn.relu(g @ params["w1"] + params["b1"][0])
    z = jax.nn.relu(z @ params["w2"] + params["b2"][0])
    return z @ params["w3"] + params["b3"][0]


def reference_forward_bf16(coord, flag, pos, params):
    """Reference mirroring the kernel's bf16-operand / f32-accumulate matmuls."""
    def mm(a, w):
        return jnp.dot(a.astype(jnp.bfloat16), w.astype(jnp.bfloat16),
                       preferred_element_type=jnp.float32)

    h = jnp.concatenate(
        [coord @ params["wc"], params["emb"][flag], params["emb"][pos]],
        axis=2).astype(jnp.float32)
    B, S, D = h.shape
    L = params["wu"].shape[0]
    scale = params["gamma"] / jnp.sqrt(params["running_var"] + BN_EPS)
    shift = params["beta"] - params["running_mean"] * scale
    for l in range(L):
        x = h
        ux = mm(x.reshape(B * S, D), params["wu"][l]).reshape(B, S, D)
        vsum = mm(x.sum(axis=1), params["wv"][l])[:, None, :]
        b = params["bu"][l, 0] + S * params["bv"][l, 0]
        x_new = jax.nn.relu(ux + vsum + b)
        h = (x + x_new) * scale[l, 0] + shift[l, 0]
    g = h.sum(axis=1)
    z = jax.nn.relu(mm(g, params["w1"]) + params["b1"][0])
    z = jax.nn.relu(mm(z, params["w2"]) + params["b2"][0])
    return mm(z, params["w3"]) + params["b3"][0]


def make_params(key, coord_input_dim, feat_dict_size, embed_dim, n_layers,
                feedforward_dim, n_classes):
    D = embed_dim * 3
    ks = jax.random.split(key, 16)

    def u(k, shape, fan_in):
        s = 1.0 / math.sqrt(fan_in)
        return jax.random.uniform(k, shape, jnp.float32, -s, s)

    return {
        "wc": u(ks[0], (coord_input_dim, embed_dim), coord_input_dim),
        "emb": jax.random.normal(ks[1], (feat_dict_size, embed_dim), jnp.float32),
        "wu": u(ks[2], (n_layers, D, D), D),
        "bu": u(ks[3], (n_layers, 1, D), D),
        "wv": u(ks[4], (n_layers, D, D), D),
        "bv": u(ks[5], (n_layers, 1, D), D),
        "gamma": u(ks[6], (n_layers, 1, D), D),
        "beta": u(ks[7], (n_layers, 1, D), D),
        "running_mean": jnp.zeros((n_layers, 1, D), jnp.float32),
        "running_var": jnp.ones((n_layers, 1, D), jnp.float32),
        "w1": u(ks[8], (D, feedforward_dim), D),
        "b1": u(ks[9], (1, feedforward_dim), D),
        "w2": u(ks[10], (feedforward_dim, feedforward_dim), feedforward_dim),
        "b2": u(ks[11], (1, feedforward_dim), feedforward_dim),
        "w3": u(ks[12], (feedforward_dim, n_classes), feedforward_dim),
        "b3": u(ks[13], (1, n_classes), feedforward_dim),
    }


if __name__ == "__main__":
    # Small, forward-consistent shapes.  batch_tile=2 exercises the parallel
    # batch-tile grid axis (grid = (2, n_layers)).
    B, S = 4, 8
    coord_input_dim = 4
    feat_dict_size = 10
    embed_dim = 32            # -> GCN width D = 96 (lane-padded to 128 in wrapper)
    n_layers = 3
    feedforward_dim = 128
    n_classes = 5             # lane-padded to 128, sliced back after the kernel
    batch_tile = 2

    key = jax.random.PRNGKey(0)
    k_coord, k_flag, k_pos, k_params = jax.random.split(key, 4)

    coord = jax.random.normal(k_coord, (B, S, coord_input_dim), jnp.float32)
    flag = jax.random.randint(k_flag, (B, S), 0, feat_dict_size, jnp.int32)
    pos = jax.random.randint(k_pos, (B, S), 0, feat_dict_size, jnp.int32)

    params = make_params(k_params, coord_input_dim, feat_dict_size, embed_dim,
                         n_layers, feedforward_dim, n_classes)

    logits = jax.block_until_ready(
        graph_conv_net_classifier(coord, flag, pos, params,
                                  batch_tile=batch_tile))

    assert logits.shape == (B, n_classes), logits.shape
    assert bool(jnp.all(jnp.isfinite(logits)))

    ref_bf16 = jax.block_until_ready(
        reference_forward_bf16(coord, flag, pos, params))
    ref_f32 = jax.block_until_ready(
        reference_forward_f32(coord, flag, pos, params))

    if not jnp.allclose(logits, ref_bf16, rtol=1e-2, atol=1e-2):
        raise AssertionError(
            f"mismatch vs bf16-aware reference:\n{logits}\n{ref_bf16}")
    if not jnp.allclose(logits, ref_f32, rtol=3e-2, atol=3e-2):
        raise AssertionError(
            f"mismatch vs f32 reference:\n{logits}\n{ref_f32}")

    print("KERNEL_OK")
</pallas_src>

<mosaic_0001>
module attributes {stable_mosaic.version = 11 : i64} {
  func.func @gcn_classifier_kernel(%arg0: i32, %arg1: i32, %arg2: memref<2x16x128xf32, #tpu.memory_space<any>>, %arg3: memref<1x128x128xbf16, #tpu.memory_space<vmem>>, %arg4: memref<1x128x128xbf16, #tpu.memory_space<vmem>>, %arg5: memref<1x3x128xf32, #tpu.memory_space<vmem>>, %arg6: memref<128x128xbf16, #tpu.memory_space<any>>, %arg7: memref<1x128xf32, #tpu.memory_space<vmem>>, %arg8: memref<128x128xbf16, #tpu.memory_space<any>>, %arg9: memref<1x128xf32, #tpu.memory_space<vmem>>, %arg10: memref<128x128xbf16, #tpu.memory_space<any>>, %arg11: memref<1x128xf32, #tpu.memory_space<vmem>>, %arg12: memref<1x2x128xf32, #tpu.memory_space<vmem>>, %arg13: memref<16x128xf32, #tpu.memory_space<vmem>>, %arg14: memref<128x128xbf16, #tpu.memory_space<vmem>>, %arg15: memref<128x128xbf16, #tpu.memory_space<vmem>>, %arg16: memref<128x128xbf16, #tpu.memory_space<vmem>>, %arg17: memref<4x!tpu.dma_semaphore, #tpu.memory_space<semaphore_mem>>) attributes {dimension_semantics = [#tpu.dimension_semantics<parallel>, #tpu.dimension_semantics<arbitrary>], iteration_bounds = array<i64: 2, 3>, scalar_prefetch = 0 : i64, scratch_operands = 5 : i64, tpu.core_type = #tpu.core_type<tc>, window_params = [{}, {transform_indices = @transform_1, window_bounds = array<i64: 1, 128, 128>}, {transform_indices = @transform_2, window_bounds = array<i64: 1, 128, 128>}, {transform_indices = @transform_3, window_bounds = array<i64: 1, 3, 128>}, {}, {pipeline_mode = #tpu.pipeline_mode<synchronous>, transform_indices = @transform_5, window_bounds = array<i64: 1, 128>}, {}, {pipeline_mode = #tpu.pipeline_mode<synchronous>, transform_indices = @transform_7, window_bounds = array<i64: 1, 128>}, {}, {pipeline_mode = #tpu.pipeline_mode<synchronous>, transform_indices = @transform_9, window_bounds = array<i64: 1, 128>}, {transform_indices = @transform_10, window_bounds = array<i64: 1, 2, 128>}]} {
    %c0_i32 = arith.constant 0 : i32
    %0 = arith.cmpi eq, %arg1, %c0_i32 : i32
    %1 = arith.extui %0 : i1 to i32
    %c0_i32_0 = arith.constant 0 : i32
    %2 = arith.cmpi ne, %1, %c0_i32_0 : i32
    scf.if %2 {
      %c1_i32 = arith.constant 1 : i32
      %40 = tpu.memref_slice %arg17[%c1_i32] : memref<4x!tpu.dma_semaphore, #tpu.memory_space<semaphore_mem>> -> memref<1x!tpu.dma_semaphore, #tpu.memory_space<semaphore_mem>>
      %41 = tpu.memref_squeeze %40 : memref<1x!tpu.dma_semaphore, #tpu.memory_space<semaphore_mem>> -> memref<!tpu.dma_semaphore, #tpu.memory_space<semaphore_mem>>
      tpu.enqueue_dma source(%arg6 : memref<128x128xbf16, #tpu.memory_space<any>>) target(%arg14 : memref<128x128xbf16, #tpu.memory_space<vmem>>) target_semaphore(%41 : memref<!tpu.dma_semaphore, #tpu.memory_space<semaphore_mem>>)
      %c2_i32_17 = arith.constant 2 : i32
      %42 = tpu.memref_slice %arg17[%c2_i32_17] : memref<4x!tpu.dma_semaphore, #tpu.memory_space<semaphore_mem>> -> memref<1x!tpu.dma_semaphore, #tpu.memory_space<semaphore_mem>>
      %43 = tpu.memref_squeeze %42 : memref<1x!tpu.dma_semaphore, #tpu.memory_space<semaphore_mem>> -> memref<!tpu.dma_semaphore, #tpu.memory_space<semaphore_mem>>
      tpu.enqueue_dma source(%arg8 : memref<128x128xbf16, #tpu.memory_space<any>>) target(%arg15 : memref<128x128xbf16, #tpu.memory_space<vmem>>) target_semaphore(%43 : memref<!tpu.dma_semaphore, #tpu.memory_space<semaphore_mem>>)
      %c3_i32 = arith.constant 3 : i32
      %44 = tpu.memref_slice %arg17[%c3_i32] : memref<4x!tpu.dma_semaphore, #tpu.memory_space<semaphore_mem>> -> memref<1x!tpu.dma_semaphore, #tpu.memory_space<semaphore_mem>>
      %45 = tpu.memref_squeeze %44 : memref<1x!tpu.dma_semaphore, #tpu.memory_space<semaphore_mem>> -> memref<!tpu.dma_semaphore, #tpu.memory_space<semaphore_mem>>
      tpu.enqueue_dma source(%arg10 : memref<128x128xbf16, #tpu.memory_space<any>>) target(%arg16 : memref<128x128xbf16, #tpu.memory_space<vmem>>) target_semaphore(%45 : memref<!tpu.dma_semaphore, #tpu.memory_space<semaphore_mem>>)
      %c0_i32_18 = arith.constant 0 : i32
      %c0_i32_19 = arith.constant 0 : i32
      %c0_i32_20 = arith.constant 0 : i32
      %46 = tpu.memref_slice %arg2[%arg0, %c0_i32_19, %c0_i32_20] : memref<2x16x128xf32, #tpu.memory_space<any>> -> memref<1x16x128xf32, #tpu.memory_space<any>>
      %47 = tpu.memref_squeeze %46 : memref<1x16x128xf32, #tpu.memory_space<any>> -> memref<16x128xf32, #tpu.memory_space<any>>
      %48 = tpu.memref_slice %arg17[%c0_i32_18] : memref<4x!tpu.dma_semaphore, #tpu.memory_space<semaphore_mem>> -> memref<1x!tpu.dma_semaphore, #tpu.memory_space<semaphore_mem>>
      %49 = tpu.memref_squeeze %48 : memref<1x!tpu.dma_semaphore, #tpu.memory_space<semaphore_mem>> -> memref<!tpu.dma_semaphore, #tpu.memory_space<semaphore_mem>>
      tpu.enqueue_dma source(%47 : memref<16x128xf32, #tpu.memory_space<any>>) target(%arg13 : memref<16x128xf32, #tpu.memory_space<vmem>>) target_semaphore(%49 : memref<!tpu.dma_semaphore, #tpu.memory_space<semaphore_mem>>)
      %c0_i32_21 = arith.constant 0 : i32
      %c0_i32_22 = arith.constant 0 : i32
      %c0_i32_23 = arith.constant 0 : i32
      %50 = tpu.memref_slice %arg2[%arg0, %c0_i32_22, %c0_i32_23] : memref<2x16x128xf32, #tpu.memory_space<any>> -> memref<1x16x128xf32, #tpu.memory_space<any>>
      %51 = tpu.memref_squeeze %50 : memref<1x16x128xf32, #tpu.memory_space<any>> -> memref<16x128xf32, #tpu.memory_space<any>>
      %52 = tpu.memref_slice %arg17[%c0_i32_21] : memref<4x!tpu.dma_semaphore, #tpu.memory_space<semaphore_mem>> -> memref<1x!tpu.dma_semaphore, #tpu.memory_space<semaphore_mem>>
      %53 = tpu.memref_squeeze %52 : memref<1x!tpu.dma_semaphore, #tpu.memory_space<semaphore_mem>> -> memref<!tpu.dma_semaphore, #tpu.memory_space<semaphore_mem>>
      tpu.wait_dma2 semaphore(%53 : memref<!tpu.dma_semaphore, #tpu.memory_space<semaphore_mem>>) src(%51 : memref<16x128xf32, #tpu.memory_space<any>>) dst(%arg13 : memref<16x128xf32, #tpu.memory_space<vmem>>)
    } else {
    }
    %c0 = arith.constant 0 : index
    %c0_1 = arith.constant 0 : index
    %3 = vector.load %arg13[%c0, %c0_1] : memref<16x128xf32, #tpu.memory_space<vmem>>, vector<16x128xf32>
    %4 = arith.truncf %3 : vector<16x128xf32> to vector<16x128xbf16>
    %c0_2 = arith.constant 0 : index
    %c0_3 = arith.constant 0 : index
    %c0_4 = arith.constant 0 : index
    %5 = vector.load %arg3[%c0_2, %c0_3, %c0_4] : memref<1x128x128xbf16, #tpu.memory_space<vmem>>, vector<1x128x128xbf16>
    %6 = vector.shape_cast %5 : vector<1x128x128xbf16> to vector<128x128xbf16>
    %cst = arith.constant dense<0.000000e+00> : vector<16x128xf32>
    %7 = tpu.matmul %4, %6, %cst {dimension_numbers = #tpu.dot_dimension_numbers<[1], [0], [0], [1], [0, 0, 1, 1], [], []>} : vector<16x128xbf16>, vector<128x128xbf16>, vector<16x128xf32> -> vector<16x128xf32>
    %8 = vector.shape_cast %3 : vector<16x128xf32> to vector<2x8x128xf32>
    %cst_5 = arith.constant dense<0.000000e+00> : vector<2x128xf32>
    %9 = vector.multi_reduction <add>, %8, %cst_5 [1] : vector<2x8x128xf32> to vector<2x128xf32>
    %10 = arith.truncf %9 : vector<2x128xf32> to vector<2x128xbf16>
    %c0_6 = arith.constant 0 : index
    %c0_7 = arith.constant 0 : index
    %c0_8 = arith.constant 0 : index
    %11 = vector.load %arg4[%c0_6, %c0_7, %c0_8] : memref<1x128x128xbf16, #tpu.memory_space<vmem>>, vector<1x128x128xbf16>
    %12 = vector.shape_cast %11 : vector<1x128x128xbf16> to vector<128x128xbf16>
    %cst_9 = arith.constant dense<0.000000e+00> : vector<2x128xf32>
    %13 = tpu.matmul %10, %12, %cst_9 {dimension_numbers = #tpu.dot_dimension_numbers<[1], [0], [0], [1], [0, 0, 1, 1], [], []>} : vector<2x128xbf16>, vector<128x128xbf16>, vector<2x128xf32> -> vector<2x128xf32>
    %c0_10 = arith.constant 0 : index
    %c0_11 = arith.constant 0 : index
    %c0_12 = arith.constant 0 : index
    %14 = vector.load %arg5[%c0_10, %c0_11, %c0_12] : memref<1x3x128xf32, #tpu.memory_space<vmem>>, vector<1x3x128xf32>
    %15 = vector.shape_cast %14 : vector<1x3x128xf32> to vector<3x128xf32>
    %16 = vector.extract_strided_slice %15 {offsets = [0, 0], sizes = [1, 128], strides = [1, 1]} : vector<3x128xf32> to vector<1x128xf32>
    %17 = vector.shape_cast %16 : vector<1x128xf32> to vector<1x1x128xf32>
    %18 = vector.extract_strided_slice %15 {offsets = [1, 0], sizes = [1, 128], strides = [1, 1]} : vector<3x128xf32> to vector<1x128xf32>
    %19 = vector.shape_cast %18 : vector<1x128xf32> to vector<1x1x128xf32>
    %20 = vector.extract_strided_slice %15 {offsets = [2, 0], sizes = [1, 128], strides = [1, 1]} : vector<3x128xf32> to vector<1x128xf32>
    %21 = vector.shape_cast %20 : vector<1x128xf32> to vector<1x1x128xf32>
    %22 = vector.shape_cast %7 : vector<16x128xf32> to vector<2x8x128xf32>
    %23 = vector.shape_cast %13 : vector<2x128xf32> to vector<2x1x128xf32>
    %24 = vector.broadcast %23 : vector<2x1x128xf32> to vector<2x8x128xf32>
    %25 = arith.addf %22, %24 : vector<2x8x128xf32>
    %26 = vector.broadcast %17 : vector<1x1x128xf32> to vector<2x8x128xf32>
    %27 = arith.addf %25, %26 : vector<2x8x128xf32>
    %cst_13 = arith.constant 0.000000e+00 : f32
    %28 = vector.broadcast %cst_13 : f32 to vector<2x8x128xf32>
    %29 = arith.maximumf %27, %28 : vector<2x8x128xf32>
    %30 = arith.addf %8, %29 : vector<2x8x128xf32>
    %31 = vector.broadcast %19 : vector<1x1x128xf32> to vector<2x8x128xf32>
    %32 = arith.mulf %30, %31 : vector<2x8x128xf32>
    %33 = vector.broadcast %21 : vector<1x1x128xf32> to vector<2x8x128xf32>
    %34 = arith.addf %32, %33 : vector<2x8x128xf32>
    %35 = vector.shape_cast %34 : vector<2x8x128xf32> to vector<16x128xf32>
    %c0_14 = arith.constant 0 : index
    %c0_15 = arith.constant 0 : index
    %36 = vector.load %arg13[%c0_14, %c0_15] : memref<16x128xf32, #tpu.memory_space<vmem>>, vector<16x128xf32>
    tpu.vector_store %arg13[%c0_14, %c0_15], %35 {strides = array<i32>} : memref<16x128xf32, #tpu.memory_space<vmem>>, vector<16x128xf32>,
    %c2_i32 = arith.constant 2 : i32
    %37 = arith.cmpi eq, %arg1, %c2_i32 : i32
    %38 = arith.extui %37 : i1 to i32
    %c0_i32_16 = arith.constant 0 : i32
    %39 = arith.cmpi ne, %38, %c0_i32_16 : i32
    scf.if %39 {
      %c1_i32 = arith.constant 1 : i32
      %40 = tpu.memref_slice %arg17[%c1_i32] : memref<4x!tpu.dma_semaphore, #tpu.memory_space<semaphore_mem>> -> memref<1x!tpu.dma_semaphore, #tpu.memory_space<semaphore_mem>>
      %41 = tpu.memref_squeeze %40 : memref<1x!tpu.dma_semaphore, #tpu.memory_space<semaphore_mem>> -> memref<!tpu.dma_semaphore, #tpu.memory_space<semaphore_mem>>
      tpu.wait_dma2 semaphore(%41 : memref<!tpu.dma_semaphore, #tpu.memory_space<semaphore_mem>>) src(%arg6 : memref<128x128xbf16, #tpu.memory_space<any>>) dst(%arg14 : memref<128x128xbf16, #tpu.memory_space<vmem>>)
      %c2_i32_17 = arith.constant 2 : i32
      %42 = tpu.memref_slice %arg17[%c2_i32_17] : memref<4x!tpu.dma_semaphore, #tpu.memory_space<semaphore_mem>> -> memref<1x!tpu.dma_semaphore, #tpu.memory_space<semaphore_mem>>
      %43 = tpu.memref_squeeze %42 : memref<1x!tpu.dma_semaphore, #tpu.memory_space<semaphore_mem>> -> memref<!tpu.dma_semaphore, #tpu.memory_space<semaphore_mem>>
      tpu.wait_dma2 semaphore(%43 : memref<!tpu.dma_semaphore, #tpu.memory_space<semaphore_mem>>) src(%arg8 : memref<128x128xbf16, #tpu.memory_space<any>>) dst(%arg15 : memref<128x128xbf16, #tpu.memory_space<vmem>>)
      %c3_i32 = arith.constant 3 : i32
      %44 = tpu.memref_slice %arg17[%c3_i32] : memref<4x!tpu.dma_semaphore, #tpu.memory_space<semaphore_mem>> -> memref<1x!tpu.dma_semaphore, #tpu.memory_space<semaphore_mem>>
      %45 = tpu.memref_squeeze %44 : memref<1x!tpu.dma_semaphore, #tpu.memory_space<semaphore_mem>> -> memref<!tpu.dma_semaphore, #tpu.memory_space<semaphore_mem>>
      tpu.wait_dma2 semaphore(%45 : memref<!tpu.dma_semaphore, #tpu.memory_space<semaphore_mem>>) src(%arg10 : memref<128x128xbf16, #tpu.memory_space<any>>) dst(%arg16 : memref<128x128xbf16, #tpu.memory_space<vmem>>)
      %cst_18 = arith.constant dense<0.000000e+00> : vector<2x128xf32>
      %46 = vector.multi_reduction <add>, %34, %cst_18 [1] : vector<2x8x128xf32> to vector<2x128xf32>
      %47 = arith.truncf %46 : vector<2x128xf32> to vector<2x128xbf16>
      %c0_19 = arith.constant 0 : index
      %c0_20 = arith.constant 0 : index
      %48 = vector.load %arg14[%c0_19, %c0_20] : memref<128x128xbf16, #tpu.memory_space<vmem>>, vector<128x128xbf16>
      %cst_21 = arith.constant dense<0.000000e+00> : vector<2x128xf32>
      %49 = tpu.matmul %47, %48, %cst_21 {dimension_numbers = #tpu.dot_dimension_numbers<[1], [0], [0], [1], [0, 0, 1, 1], [], []>} : vector<2x128xbf16>, vector<128x128xbf16>, vector<2x128xf32> -> vector<2x128xf32>
      %c0_22 = arith.constant 0 : index
      %c0_23 = arith.constant 0 : index
      %50 = vector.load %arg7[%c0_22, %c0_23] : memref<1x128xf32, #tpu.memory_space<vmem>>, vector<1x128xf32>
      %51 = vector.broadcast %50 : vector<1x128xf32> to vector<2x128xf32>
      %52 = arith.addf %49, %51 : vector<2x128xf32>
      %cst_24 = arith.constant 0.000000e+00 : f32
      %53 = vector.broadcast %cst_24 : f32 to vector<2x128xf32>
      %54 = arith.maximumf %52, %53 : vector<2x128xf32>
      %55 = arith.truncf %54 : vector<2x128xf32> to vector<2x128xbf16>
      %c0_25 = arith.constant 0 : index
      %c0_26 = arith.constant 0 : index
      %56 = vector.load %arg15[%c0_25, %c0_26] : memref<128x128xbf16, #tpu.memory_space<vmem>>, vector<128x128xbf16>
      %cst_27 = arith.constant dense<0.000000e+00> : vector<2x128xf32>
      %57 = tpu.matmul %55, %56, %cst_27 {dimension_numbers = #tpu.dot_dimension_numbers<[1], [0], [0], [1], [0, 0, 1, 1], [], []>} : vector<2x128xbf16>, vector<128x128xbf16>, vector<2x128xf32> -> vector<2x128xf32>
      %c0_28 = arith.constant 0 : index
      %c0_29 = arith.constant 0 : index
      %58 = vector.load %arg9[%c0_28, %c0_29] : memref<1x128xf32, #tpu.memory_space<vmem>>, vector<1x128xf32>
      %59 = vector.broadcast %58 : vector<1x128xf32> to vector<2x128xf32>
      %60 = arith.addf %57, %59 : vector<2x128xf32>
      %cst_30 = arith.constant 0.000000e+00 : f32
      %61 = vector.broadcast %cst_30 : f32 to vector<2x128xf32>
      %62 = arith.maximumf %60, %61 : vector<2x128xf32>
      %63 = arith.truncf %62 : vector<2x128xf32> to vector<2x128xbf16>
      %c0_31 = arith.constant 0 : index
      %c0_32 = arith.constant 0 : index
      %64 = vector.load %arg16[%c0_31, %c0_32] : memref<128x128xbf16, #tpu.memory_space<vmem>>, vector<128x128xbf16>
      %cst_33 = arith.constant dense<0.000000e+00> : vector<2x128xf32>
      %65 = tpu.matmul %63, %64, %cst_33 {dimension_numbers = #tpu.dot_dimension_numbers<[1], [0], [0], [1], [0, 0, 1, 1], [], []>} : vector<2x128xbf16>, vector<128x128xbf16>, vector<2x128xf32> -> vector<2x128xf32>
      %c0_34 = arith.constant 0 : index
      %c0_35 = arith.constant 0 : index
      %66 = vector.load %arg11[%c0_34, %c0_35] : memref<1x128xf32, #tpu.memory_space<vmem>>, vector<1x128xf32>
      %67 = vector.broadcast %66 : vector<1x128xf32> to vector<2x128xf32>
      %68 = arith.addf %65, %67 : vector<2x128xf32>
      %c0_36 = arith.constant 0 : index
      %c0_37 = arith.constant 0 : index
      %c0_38 = arith.constant 0 : index
      %69 = vector.load %arg12[%c0_36, %c0_37, %c0_38] : memref<1x2x128xf32, #tpu.memory_space<vmem>>, vector<1x2x128xf32>
      %70 = vector.shape_cast %69 : vector<1x2x128xf32> to vector<2x128xf32>
      %71 = vector.shape_cast %68 : vector<2x128xf32> to vector<1x2x128xf32>
      tpu.vector_store %arg12[%c0_36, %c0_37, %c0_38], %71 {strides = array<i32>} : memref<1x2x128xf32, #tpu.memory_space<vmem>>, vector<1x2x128xf32>,
    } else {
    }
    return
  }
  func.func @transform_1(%arg0: i32, %arg1: i32) -> (i32, i32, i32) {
    %c0_i32 = arith.constant 0 : i32
    %c0_i32_0 = arith.constant 0 : i32
    %c0_i32_1 = arith.constant 0 : i32
    return %arg1, %c0_i32, %c0_i32_0 : i32, i32, i32
  }
  func.func @transform_2(%arg0: i32, %arg1: i32) -> (i32, i32, i32) {
    %c0_i32 = arith.constant 0 : i32
    %c0_i32_0 = arith.constant 0 : i32
    %c0_i32_1 = arith.constant 0 : i32
    return %arg1, %c0_i32, %c0_i32_0 : i32, i32, i32
  }
  func.func @transform_3(%arg0: i32, %arg1: i32) -> (i32, i32, i32) {
    %c0_i32 = arith.constant 0 : i32
    %c0_i32_0 = arith.constant 0 : i32
    %c0_i32_1 = arith.constant 0 : i32
    return %arg1, %c0_i32, %c0_i32_0 : i32, i32, i32
  }
  func.func @transform_5(%arg0: i32, %arg1: i32) -> (i32, i32) {
    %c0_i32 = arith.constant 0 : i32
    %c0_i32_0 = arith.constant 0 : i32
    %c0_i32_1 = arith.constant 0 : i32
    return %c0_i32, %c0_i32_0 : i32, i32
  }
  func.func @transform_7(%arg0: i32, %arg1: i32) -> (i32, i32) {
    %c0_i32 = arith.constant 0 : i32
    %c0_i32_0 = arith.constant 0 : i32
    %c0_i32_1 = arith.constant 0 : i32
    return %c0_i32, %c0_i32_0 : i32, i32
  }
  func.func @transform_9(%arg0: i32, %arg1: i32) -> (i32, i32) {
    %c0_i32 = arith.constant 0 : i32
    %c0_i32_0 = arith.constant 0 : i32
    %c0_i32_1 = arith.constant 0 : i32
    return %c0_i32, %c0_i32_0 : i32, i32
  }
  func.func @transform_10(%arg0: i32, %arg1: i32) -> (i32, i32, i32) {
    %c0_i32 = arith.constant 0 : i32
    %c0_i32_0 = arith.constant 0 : i32
    %c0_i32_1 = arith.constant 0 : i32
    return %arg0, %c0_i32, %c0_i32_0 : i32, i32, i32
  }
}

</mosaic_0001>

<bundles_post_ra>
// kernel: tpu_custom_call.1
= control target key start
LH: loop header
LB: loop body
LE: loop exit
PB: predicated region body
PF: predicated region fallthrough
CT: control target
= control target key end

     0   :  { %s2148_s0 = inlined_call_operand.hbm [shape: f32[2,16,128], index: 0, kind: input, shape index: {}]   ;;  %s2149_s1 = inlined_call_operand.hbm [shape: bf16[3,128,128], index: 1, kind: input, shape index: {}]   ;;  %s2150_s2 = inlined_call_operand.hbm [shape: bf16[3,128,128], index: 2, kind: input, shape index: {}]   ;;  %s2151_s3 = inlined_call_operand.hbm [shape: f32[3,3,128], index: 3, kind: input, shape index: {}]   ;;  %s2152_s4 = inlined_call_operand.hbm [shape: bf16[128,128], index: 4, kind: input, shape index: {}]   ;;  %s2153_s5 = inlined_call_operand.vmem [shape: f32[1,128], index: 5, kind: input, shape index: {}]   ;;  %s2154_s6 = inlined_call_operand.hbm [shape: bf16[128,128], index: 6, kind: input, shape index: {}]   ;;  %s2155_s7 = inlined_call_operand.vmem [shape: f32[1,128], index: 7, kind: input, shape index: {}]   ;;  %s2156_s8 = inlined_call_operand.hbm [shape: bf16[128,128], index: 8, kind: input, shape index: {}]   ;;  %s2157_s9 = inlined_call_operand.vmem [shape: f32[1,128], index: 9, kind: input, shape index: {}]   ;;  %s2158_s10 = inlined_call_operand.hbm [shape: f32[2,2,128], index: 10, kind: output, shape index: {}]  }
   0x1   :  { %2172 = sst [smem:[#allocation43_spill]] %s2148_s0 }
   0x2   :  { %2173 = sst [smem:[#allocation44_spill]] %s2150_s2 }
   0x3   :  { %2174 = sst [smem:[#allocation45_spill]] %s2152_s4 }
   0x4   :  { %2175 = sst [smem:[#allocation46_spill]] %s2153_s5 }
   0x5   :  { %2176 = sst [smem:[#allocation47_spill]] %s2154_s6 }
   0x6   :  { %2177 = sst [smem:[#allocation48_spill]] %s2155_s7 }
   0x7   :  { %2178 = sst [smem:[#allocation49_spill]] %s2156_s8 }
   0x8   :  { %2179 = sst [smem:[#allocation50_spill]] %s2157_s9 }
   0x9   :  { %2180 = sst [smem:[#allocation51_spill]] %s2158_s10 }
   0xa   :  { %15 = vsyncpa [#allocation8], 0 }
   0xb   :  { %17 = vsyncpa [#allocation8 + $0x1], 0 }
   0xc   :  { %18 = vsyncpa [#allocation11], 0 }
   0xd   :  { %20 = vsyncpa [#allocation11 + $0x1], 0 }
   0xe   :  { %21 = vsyncpa [#allocation9], 0 }
   0xf   :  { %23 = vsyncpa [#allocation9 + $0x1], 0  ;;  %s1846_s13 = smov 0   ;;  %s1848_s14 = smov 0  }
  0x10   :  { %s1850_s15 = smov 0   ;;  %s1852_s16 = smov 0  }
  0x11   :  { %s1854_s17 = smov 0   ;;  %s1856_s18 = smov 0  }
  0x12   :  { %s1858_s19 = smov 0   ;;  %s1860_s20 = smov 0  }
  0x13   :  { %s1862_s21 = smov 0   ;;  %s1864_s22 = smov 0  }
  0x14   :  { %s1866_s23 = smov 0  }
  0x15 LB: > { %2181 = sst [smem:[#allocation31_spill]] %s1743_s13  ;;  %s1900_s24 = sadd.s32 4294967295, %s1783_s23   ;;  %s1783_s23 = sphi %s1866_s23, %s29_s23   ;;  %s1779_s22 = sphi %s1864_s22, %s2221_s22   ;;  %s1775_s21 = sphi %s1862_s21, %s2227_s21   ;;  %s1771_s20 = sphi %s1860_s20, %s2219_s20   ;;  %s1767_s19 = sphi %s1858_s19, %s2226_s19   ;;  %s1763_s18 = sphi %s1856_s18, %s2218_s18   ;;  %s1759_s17 = sphi %s1854_s17, %s2225_s17   ;;  %s1755_s16 = sphi %s1852_s16, %s2224_s16   ;;  %s1751_s15 = sphi %s1850_s15, %s2216_s15   ;;  %s1747_s14 = sphi %s1848_s14, %s2223_s14   ;;  %s1743_s13 = sphi %s1846_s13, %s2222_s13  }
  0x16   : > { %2182 = sst [smem:[#allocation32_spill]] %s1751_s15  ;;  %s1088_s25 = sadd.s32 4294967294, %s1783_s23  }
  0x17   : > { %2183 = sst [smem:[#allocation33_spill]] %s1763_s18  ;;  %s38_s26 = sadd.s32 1, %s1775_s21 }
  0x18   : > { %2184 = sst [smem:[#allocation34_spill]] %s1771_s20  ;;  %s41_s27 = sadd.s32 1, %s1779_s22 }
  0x19   : > { %2185 = sst [smem:[#allocation35_spill]] %s1779_s22  ;;  %p39_p0 = scmp.ge.s32.totalorder %s38_s26, 3 }
  0x1a   : > { %2186 = sst [smem:[#allocation36_spill]] %s1783_s23  ;;  %s48_s28 = sadd.s32 1, %s1763_s18 }
  0x1b   : > { %p55_p1 = scmp.ne.s32.totalorder %s1763_s18, %s1759_s17  ;;  %p56_p2 = scmp.eq.s32.totalorder %s1783_s23, 0 }
  0x1c   : > { %s2229_s26 = smov (%p39_p0, %s38_s26), 0  ;;  %s2231_s27 = smov (!%p39_p0, %s41_s27), %s1779_s22 }
  0x1d   : > { %2187 = sst [smem:[#allocation37_spill]] %s2229_s26  ;;  %s45_s29 = ssub.s32 %s1775_s21, %s2229_s26 }
  0x1e   : > { %p1914_p3 = por %p56_p2, %p55_p1  ;;  %p43_p4 = scmp.ge.s32.totalorder %s2231_s27, 2 }
  0x1f   : > { %p46_p5 = scmp.eq.s32.totalorder %s45_s29, 0  ;;  %p61_p6 = scmp.ne.s32.totalorder %s1759_s17, %s1755_s16 }
  0x20   : > { %p62_p7 = scmp.eq.s32.totalorder %s1900_s24, 0  ;;  %s2233_s27 = smov (%p43_p4, %s2231_s27), 0 }
  0x21   : > { %2189 = sst [smem:[#allocation38_spill]] %s2233_s27  ;;  %s186_s26 = ssub.s32 %s1779_s22, %s2233_s27 }
  0x22   : > { %s1923_s11 = scalar_select %p46_p5, %s1763_s18, %s48_s28  }
  0x23   : > { %p1925_p8 = por %p62_p7, %p61_p6  ;;  %p187_p9 = scmp.eq.s32.totalorder %s186_s26, 0 }
  0x24   : > { %2190 = sst [smem:[#allocation39_spill]] %s1923_s11  ;;  %s189_s10 = sadd.s32 1, %s1751_s15 }
  0x25   : > { %p199_p10 = scmp.ne.s32.totalorder %s1751_s15, %s1747_s14  ;;  %p200_p11 = scmp.eq.s32.totalorder %s1900_s24, 5 }
  0x26   : > { %s1936_s29 = scalar_select %p187_p9, %s1751_s15, %s189_s10  }
  0x27   : > { %p1938_p12 = por %p200_p11, %p199_p10  ;;  %p205_p13 = scmp.ne.s32.totalorder %s1747_s14, %s1743_s13 }
  0x28   : > { %2192 = sst [smem:[#allocation40_spill]] %s1936_s29  ;;  %p206_p0 = scmp.eq.s32.totalorder %s1088_s25, 5 }
  0x29   : > { %s2193_s16 = scalar_select %p1938_p12, 1, 0 }
  0x2a   : > { %p1345_p1 = scmp.lt.s32.totalorder %s1783_s23, 6  ;;  %s1946_s28 = sand.u32 1, %s1763_s18  }
  0x2b   : > { %2194 = sst [smem:[#allocation41_spill]] %s2193_s16  ;;  %p1948_p2 = por %p206_p0, %p205_p13 }
  0x2c   : > { %s1091_s26 = sshll.u32 %s1946_s28, 6  ;;  %s1275_s27 = sshll.u32 %s1775_s21, 6 }
  0x2d   : > { %s2195_s11 = scalar_select %p1948_p2, 1, 0 }
  0x2e   : > { %p1956_p4 = pnand %p1345_p1, %p1914_p3  ;;  %s257_s22 = sand.u32 1, %s1783_s23  }
  0x2f   : > { %2196 = sst [smem:[#allocation42_spill]] %s2195_s11  ;;  %s261_s15 = scalar_lea.vmem [#allocation10], %s1091_s26 }
  0x30   : > { %s2198_s2 = sld [smem:[#allocation44_spill]]  ;;  %s269_s13 = sshll.u32 %s261_s15, 4  ;;  %s270_s13 = int_to_ptr.vmem [resolvable:$true] %s269_s13 }
  0x31   : > { %p1099_p5 = scmp.ge.s32.totalorder %s1783_s23, 1  ;;  %s258_s30 = scalar_lea.sflag [#allocation11], %s257_s22 }
  0x32   : > { %s1785_s11 = smov 64   ;;  %s1786_s9 = smov 4  }
  0x33   : > { %p296_p3 = scmp.lt.s32.totalorder %s1783_s23, 7  ;;  %s239_s25 = scalar_lea.vmem [#allocation7], %s1091_s26 }
  0x34   : > { %s1097_s22 = sshll.u32 %s1946_s28, 2  ;;  %s236_s0 = scalar_lea.sflag [#allocation8], %s1946_s28 }
  0x35   : > { %p1968_p6 = pnand %p1099_p5, %p296_p3  ;;  %s283_s6 = scalar_lea.vmem [#allocation12], %s1097_s22 }
  0x36   : > { %s266_s18 = scalar_lea.hbm %s2198_s2, %s1275_s27  ;;  %s247_s2 = sshll.u32 %s239_s25, 4  ;;  %s248_s2 = int_to_ptr.vmem [resolvable:$true] %s247_s2 }
  0x37   : > { %s267_s16 = sshll.u32 %s266_s18, 4  ;;  %s244_s18 = scalar_lea.hbm %s2149_s1, %s1275_s27  ;;  %s268_s16 = int_to_ptr.hbm [resolvable:$true] %s267_s16 }
  0x38   : > { %1337 = dma.hbm_to_vmem [thread:$0]  (!%p1956_p4), %s268_s16, 1024, %s270_s13, %s258_s30, %s1785_s11, %s1785_s11, %s1786_s9  }
  0x39   : > { %s245_s5 = sshll.u32 %s244_s18, 4  ;;  %s1098_s13 = sshll.u32 %s1775_s21, 2  ;;  %s246_s5 = int_to_ptr.hbm [resolvable:$true] %s245_s5 }
  0x3a   : > { %1334 = dma.hbm_to_vmem [thread:$0]  (!%p1956_p4), %s246_s5, 1024, %s248_s2, %s236_s0, %s1785_s11, %s1785_s11, %s1786_s9  }
  0x3b   : > { %s287_s8 = scalar_lea.hbm %s2151_s3, %s1098_s13  ;;  %s291_s20 = sshll.u32 %s283_s6, 4  ;;  %s292_s20 = int_to_ptr.vmem [resolvable:$true] %s291_s20 }
  0x3c   : > { %s289_s4 = sshll.u32 %s287_s8, 4  ;;  %300 = sbr.rel (%p1968_p6) target bundleno = 740 (0x2e4), region = 44  ;;  %s290_s4 = int_to_ptr.hbm [resolvable:$true] %s289_s4 }
  0x3d   : > { %1340 = dma.hbm_to_vmem [thread:$0]  (!%p1956_p4), %s290_s4, 64, %s292_s20, %s258_s30  }
  0x3e   : > { %s1988_s27 = sand.u32 (!%p1968_p6), 1, %s1759_s17  }
  0x3f   : > { %s1100_s0 = sshll.u32 (!%p1968_p6), %s1988_s27, 6  ;;  %s303_s2 = scalar_lea.sflag (!%p1968_p6), [#allocation8], %s1988_s27 }
  0x40   : > { %s1992_s5 = scalar_lea.vmem (!%p1968_p6), [#allocation7], %s1100_s0 }
  0x41   : > { %1720 = dma.done.wait (%p1925_p8), %s303_s2, 1024  }
  0x42   : > { %1722 = vsyncadd (%p1925_p8), %s303_s2, 4294966272  ;;  %s312_s4 = sand.u32 1, %s1900_s24   ;;  %s1999_s7 = scalar_lea.vmem [#allocation10], %s1100_s0 }
  0x43   : > { %s313_s6 = scalar_lea.sflag [#allocation11], %s312_s4 }
  0x44   : > { %1724 = dma.done.wait (%p1925_p8), %s313_s6, 1088  }
  0x45   : > { %1726 = vsyncadd (%p1925_p8), %s313_s6, 4294966208  ;;  %s1102_s8 = sshll.u32 %s1988_s27, 2  ;;  %s363_s9 = sand.u32 1, %s1747_s14  }
  0x46   : > { %s2009_s20 = sshll.u32 %s363_s9, 1  ;;  %p1346_p7 = scmp.eq.s32.totalorder %s1767_s19, 0 }
  0x47   : > { %s2200_s11 = sld [smem:[#allocation45_spill]]  ;;  %s1787_s12 = smov [#allocation3]  }
  0x48   : > { %s2201_s26 = sld [smem:[#allocation34_spill]]  ;;  %s380_s10 = sshll.u32 %s1787_s12, 4  ;;  %s381_s10 = int_to_ptr.vmem [resolvable:$true] %s380_s10 }
  0x49   : > { %s2202_s15 = sld [smem:[#allocation47_spill]]  ;;  %s1788_s0 = smov [#allocation4]  }
  0x4a   : > { %s2203_s13 = sld [smem:[#allocation49_spill]]  ;;  %s394_s2 = sshll.u32 %s1788_s0, 4  ;;  %s395_s2 = int_to_ptr.vmem [resolvable:$true] %s394_s2 }
  0x4b   : > { %s1789_s4 = smov [#allocation5]   ;;  %s2204_s12 = sld [smem:[#allocation43_spill]] }
  0x4c   : > { %s408_s6 = sshll.u32 %s1789_s4, 4  ;;  %s409_s6 = int_to_ptr.vmem [resolvable:$true] %s408_s6 }
  0x4d   : > { %s378_s28 = sshll.u32 %s2200_s11, 4  ;;  %s379_s28 = int_to_ptr.hbm [resolvable:$true] %s378_s28 }
  0x4e   : > { %1324 = dma.hbm_to_vmem [thread:$0]  (%p1346_p7), %s379_s28, 1024, %s381_s10, [#allocation6 + $0x1] }
  0x4f   : > { %s392_s18 = sshll.u32 %s2202_s15, 4  ;;  %s1105_s23 = sshll.u32 %s2201_s26, 4  ;;  %s393_s18 = int_to_ptr.hbm [resolvable:$true] %s392_s18 }
  0x50   : > { %s406_s16 = sshll.u32 %s2203_s13, 4  ;;  %s1790_s10 = smov [#allocation2]   ;;  %s407_s16 = int_to_ptr.hbm [resolvable:$true] %s406_s16 }
  0x51   : > { %1325 = dma.hbm_to_vmem [thread:$0]  (%p1346_p7), %s393_s18, 1024, %s395_s2, [#allocation6 + $0x2] }
  0x52   : > { %s413_s30 = scalar_lea.hbm %s2204_s12, %s1105_s23  ;;  %s423_s29 = sshll.u32 %s1790_s10, 4  ;;  %s424_s29 = int_to_ptr.vmem [resolvable:$true] %s423_s29 }
  0x53   : > { %1326 = dma.hbm_to_vmem [thread:$0]  (%p1346_p7), %s407_s16, 1024, %s409_s6, [#allocation6 + $0x3] }
  0x54   : > { %s421_s28 = sshll.u32 %s413_s30, 4  ;;  %s1625_s22 = scalar_lea.hbm %s2204_s12, 32  ;;  %s422_s28 = int_to_ptr.hbm [resolvable:$true] %s421_s28 }
  0x55   : > { %s1619_s15 = sshra.s32 %s422_s28, 4  ;;  %s1620_s15 = int_to_ptr.hbm [resolvable:$true] %s1619_s15 }
  0x56   : > { %s1621_s25 = scalar_lea.hbm %s1620_s15, 16  ;;  %p1626_p11 = scmp.lt.s32.totalorder %s1620_s15, %s2204_s12 }
  0x57   : > { %p1622_p8 = scmp.ne.s32.totalorder %s1620_s15, %s1621_s25  ;;  %p1627_p13 = scmp.lt.s32.totalorder %s1625_s22, %s1621_s25 }
  0x59   : > { %p1623_p9 = pnand %p1622_p8, %p1346_p7  ;;  %p1628_p0 = por %p1627_p13, %p1626_p11 }
  0x5b   : > { %p1624_p10 = pneg %p1623_p9 }
  0x5d   : > { %p1629_p1 = pnand %p1628_p0, %p1624_p10 }
  0x5f   : > { %1632 = shalt.err (!%p1629_p1)  }
  0x60   : > { %1327 = dma.hbm_to_vmem [thread:$0]  (%p1346_p7), %s422_s28, 256, %s424_s29, [#allocation6] }
  0x61   : > { %s2043_s16 = scalar_lea.vmem [#allocation12], %s1102_s8  ;;  %s365_s2 = scalar_lea.vmem [#allocation13], %s2009_s20 }
  0x62   : > { %1728 = dma.done.wait (%p1346_p7), [#allocation6], 256 }
  0x63   : > { %1730 = vsyncadd (%p1346_p7), [#allocation6], 4294967040  ;;  %v1284_v0 = vld [vmem:[%s1992_s5 + $0x38] sm:$0xff]  ;;  %v1283_v2 = vld [vmem:[%s1992_s5 + $0x30] sm:$0xff]  ;;  %vm545_vm0 = vcmask 1041409   ;;  %p1170_p4 = scmp.ne.s32.totalorder %s1767_s19, 2 }
  0x64   : > { %v1292_v1 = vld [vmem:[%s1999_s7 + $0x38] sm:$0xff]  ;;  %497 = vmatpush.bf16.msra.mxu0 %v1284_v0  ;;  %v1291_v3 = vld [vmem:[%s1999_s7 + $0x30] sm:$0xff]  ;;  %v1282_v6 = vld [vmem:[%s1992_s5 + $0x28] sm:$0xff] }
  0x65   : > { %597 = vmatpush.bf16.msra.mxu1 %v1292_v1  ;;  %v2054_v4 = vld [vmem:[#allocation2] sm:$0xff]  ;;  %v2056_v5 = vld [vmem:[#allocation2 + $0x8] sm:$0xff]  ;;  %v1290_v7 = vld [vmem:[%s1999_s7 + $0x28] sm:$0xff] }
  0x66   : > { %v511_v8 = vrot.slane %v2054_v4, 4  ;;  %v517_v9 = vrot.slane %v2056_v5, 4  ;;  %v1281_v12 = vld [vmem:[%s1992_s5 + $0x20] sm:$0xff]  ;;  %v1280_v18 = vld [vmem:[%s1992_s5 + $0x18] sm:$0xff]  ;;  %v1279_v24 = vld [vmem:[%s1992_s5 + $0x10] sm:$0xff]  ;;  %v432_v35 = vpack.c.bf16 %v2056_v5, %v2054_v4 }
  0x67   : > { %v1289_v13 = vld [vmem:[%s1999_s7 + $0x20] sm:$0xff]  ;;  %v1288_v19 = vld [vmem:[%s1999_s7 + $0x18] sm:$0xff]  ;;  %v1287_v25 = vld [vmem:[%s1999_s7 + $0x10] sm:$0xff] }
  0x68   : > { %498 = vmatpush.bf16.msra.mxu0 %v1283_v2  ;;  %v512_v10 = vadd.f32 %v511_v8, %v2054_v4  ;;  %v518_v11 = vadd.f32 %v517_v9, %v2056_v5  ;;  %v1278_v28 = vld [vmem:[%s1992_s5 + $0x8] sm:$0xff]  ;;  %v1277_v32 = vld [vmem:[%s1992_s5] sm:$0xff] }
  0x69   : > { %598 = vmatpush.bf16.msra.mxu1 %v1291_v3  ;;  %v1286_v29 = vld [vmem:[%s1999_s7 + $0x8] sm:$0xff]  ;;  %v1285_v33 = vld [vmem:[%s1999_s7] sm:$0xff] }
  0x6a   : > { %v513_v14 = vrot.slane %v512_v10, 2  ;;  %v519_v15 = vrot.slane %v518_v11, 2  ;;  %v610_v37 = vld [vmem:[%s2043_s16] sm:$0x7] }
  0x6b   : > { %v619_v42 = vperm.slane %v610_v37, 0  ;;  %v626_v47 = vperm.slane %v610_v37, 1  ;;  %v629_v52 = vperm.slane %v610_v37, 2 }
  0x6c   : > { %499 = vmatpush.bf16.msra.mxu0 %v1282_v6  ;;  %v514_v16 = vadd.f32 %v513_v14, %v512_v10  ;;  %v520_v17 = vadd.f32 %v519_v15, %v518_v11 }
  0x6d   : > { %599 = vmatpush.bf16.msra.mxu1 %v1290_v7 }
  0x6e   : > { %v515_v20 = vrot.slane %v514_v16, 1  ;;  %v521_v21 = vrot.slane %v520_v17, 1 }
  0x70   : > { %500 = vmatpush.bf16.msra.mxu0 %v1281_v12  ;;  %v516_v22 = vadd.f32 %v515_v20, %v514_v16  ;;  %v522_v23 = vadd.f32 %v521_v21, %v520_v17 }
  0x71   : > { %600 = vmatpush.bf16.msra.mxu1 %v1289_v13 }
  0x72   : > { %v523_v26 = vpack.c.bf16 %v516_v22, %v516_v22  ;;  %v524_v27 = vpack.c.bf16 %v522_v23, %v522_v23 }
  0x74   : > { %501 = vmatpush.bf16.msra.mxu0 %v1280_v18  ;;  %v543_v30 = vunpack.c.l.b16 %v523_v26  ;;  %v544_v31 = vunpack.c.l.b16 %v524_v27 }
  0x75   : > { %601 = vmatpush.bf16.msra.mxu1 %v1288_v19 }
  0x76   : > { %v546_v34 = vsel %vm545_vm0, %v544_v31, %v543_v30 }
  0x77   : > { %v547_v36 = vpack.c.b16 %v546_v34, %v546_v34 }
  0x78   : > { %502 = vmatpush.bf16.msra.mxu0 %v1279_v24 }
  0x79   : > { %602 = vmatpush.bf16.msra.mxu1 %v1287_v25 }
  0x7c   : > { %503 = vmatpush.bf16.msra.mxu0 %v1278_v28 }
  0x7d   : > { %603 = vmatpush.bf16.msra.mxu1 %v1286_v29 }
  0x80   : > { %504 = vmatpush.bf16.msra.mxu0 %v1277_v32 }
  0x81   : > { %604 = vmatpush.bf16.msra.mxu1 %v1285_v33 }
  0x83   : > { %505 = vmatmul.bf16.vlgmr.msra.gmra.mxu0 %v432_v35 }
  0x84   : > { %605 = vmatmul.bf16.vlgmr.msra.gmra.mxu1 %v547_v36 }
 0x100   : > { %v506_v38 = vpop.f32.mrf.mxu0 }
 0x101   : > { %v606_v39 = vpop.f32.mrf.mxu1 }
 0x102   : > { %v612_v40 = vrot.slane %v606_v39, 1  ;;  %v613_v41 = vperm.slane %v606_v39, 0 }
 0x104   : > { %v617_v43 = vadd.f32 %v613_v41, %v506_v38  ;;  %v614_v44 = vperm.slane %v612_v40, 0 }
 0x106   : > { %v620_v45 = vadd.f32 %v619_v42, %v617_v43 }
 0x108   : > { %v622_v46 = vmax.f32 %v620_v45, 0.0  ;;  %v508_v48 = vpop.f32.mrf.mxu0 }
 0x109   : > { %v608_v49 = vpop.f32.mrf.mxu1  ;;  %v618_v50 = vadd.f32 %v614_v44, %v508_v48 }
 0x10a   : > { %v624_v51 = vadd.f32 %v622_v46, %v2054_v4 }
 0x10b   : > { %v621_v53 = vadd.f32 %v619_v42, %v618_v50 }
 0x10c   : > { %v627_v54 = vmul.f32 %v626_v47, %v624_v51 }
 0x10d   : > { %v623_v55 = vmax.f32 %v621_v53, 0.0 }
 0x10e   : > { %v630_v56 = vadd.f32 %v629_v52, %v627_v54 }
 0x10f   : > { %v625_v57 = vadd.f32 %v623_v55, %v2056_v5 }
 0x110   : > { %632 = vst [vmem:[#allocation2] sm:$0xff] %v630_v56 }
 0x111   : > { %v628_v58 = vmul.f32 %v626_v47, %v625_v57  ;;  %637 = sbr.rel (%p1170_p4) target bundleno = 719 (0x2cf), region = 80 }
 0x113   : > { %v631_v59 = vadd.f32 %v629_v52, %v628_v58 }
 0x115   : > { %633 = vst [vmem:[#allocation2 + $0x8] sm:$0xff] %v631_v59 }
 0x116   : > { %1731 = dma.done.wait [#allocation6 + $0x1], 1024 }
 0x117   : > { %1732 = vsyncadd [#allocation6 + $0x1], 4294966272 }
 0x118   : > { %1733 = dma.done.wait [#allocation6 + $0x2], 1024 }
 0x119   : > { %1734 = vsyncadd [#allocation6 + $0x2], 4294966272 }
 0x11a   : > { %1735 = dma.done.wait [#allocation6 + $0x3], 1024 }
 0x11b   : > { %1736 = vsyncadd [#allocation6 + $0x3], 4294966272  ;;  %v649_v60 = vrot.slane %v630_v56, 4  ;;  %v655_v61 = vrot.slane %v631_v59, 4  ;;  %v1300_v0 = vld [vmem:[#allocation3 + $0x38] sm:$0xff]  ;;  %v1299_v1 = vld [vmem:[#allocation3 + $0x30] sm:$0xff] }
 0x11c   : > { %738 = vmatpush.bf16.msra.mxu0 %v1300_v0  ;;  %v1308_v4 = vld [vmem:[#allocation4 + $0x38] sm:$0xff]  ;;  %v1307_v5 = vld [vmem:[#allocation4 + $0x30] sm:$0xff]  ;;  %v1298_v6 = vld [vmem:[#allocation3 + $0x28] sm:$0xff]  ;;  %s2205_s5 = sld [smem:[#allocation46_spill]] }
 0x11d   : > { %v650_v62 = vadd.f32 %v649_v60, %v630_v56  ;;  %v656_v63 = vadd.f32 %v655_v61, %v631_v59  ;;  %821 = vmatpush.bf16.msra.mxu1 %v1308_v4  ;;  %v1306_v9 = vld [vmem:[#allocation4 + $0x28] sm:$0xff]  ;;  %v1297_v10 = vld [vmem:[#allocation3 + $0x20] sm:$0xff]  ;;  %v1296_v14 = vld [vmem:[#allocation3 + $0x18] sm:$0xff]  ;;  %s2206_s4 = sld [smem:[#allocation48_spill]] }
 0x11e   : > { %v1305_v13 = vld [vmem:[#allocation4 + $0x20] sm:$0xff]  ;;  %v1304_v17 = vld [vmem:[#allocation4 + $0x18] sm:$0xff]  ;;  %v1295_v18 = vld [vmem:[#allocation3 + $0x10] sm:$0xff]  ;;  %s2207_s24 = sld [smem:[#allocation50_spill]] }
 0x11f   : > { %v651_v2 = vrot.slane %v650_v62, 2  ;;  %v657_v3 = vrot.slane %v656_v63, 2  ;;  %v1303_v21 = vld [vmem:[#allocation4 + $0x10] sm:$0xff]  ;;  %v1294_v22 = vld [vmem:[#allocation3 + $0x8] sm:$0xff]  ;;  %v1293_v25 = vld [vmem:[#allocation3] sm:$0xff] }
 0x120   : > { %739 = vmatpush.bf16.msra.mxu0 %v1299_v1  ;;  %v1302_v28 = vld [vmem:[#allocation4 + $0x8] sm:$0xff]  ;;  %v1301_v29 = vld [vmem:[#allocation4] sm:$0xff]  ;;  %v1316_v30 = vld [vmem:[#allocation5 + $0x38] sm:$0xff] }
 0x121   : > { %v652_v7 = vadd.f32 %v651_v2, %v650_v62  ;;  %v658_v8 = vadd.f32 %v657_v3, %v656_v63  ;;  %822 = vmatpush.bf16.msra.mxu1 %v1307_v5  ;;  %904 = vmatpush.bf16.msra.mxu2 %v1316_v30  ;;  %v1315_v31 = vld [vmem:[#allocation5 + $0x30] sm:$0xff]  ;;  %v1314_v32 = vld [vmem:[#allocation5 + $0x28] sm:$0xff]  ;;  %v1313_v33 = vld [vmem:[#allocation5 + $0x20] sm:$0xff] }
 0x122   : > { %v1312_v34 = vld [vmem:[#allocation5 + $0x18] sm:$0xff]  ;;  %v1311_v35 = vld [vmem:[#allocation5 + $0x10] sm:$0xff]  ;;  %v1310_v42 = vld [vmem:[#allocation5 + $0x8] sm:$0xff] }
 0x123   : > { %v653_v11 = vrot.slane %v652_v7, 1  ;;  %v659_v12 = vrot.slane %v658_v8, 1  ;;  %v1442_v36 = vld [vmem:[%s2205_s5] ss:$0 sm:$0xff]  ;;  %v1309_v43 = vld [vmem:[#allocation5] sm:$0xff] }
 0x124   : > { %740 = vmatpush.bf16.msra.mxu0 %v1298_v6  ;;  %v1443_v44 = vld [vmem:[%s2206_s4] ss:$0 sm:$0xff] }
 0x125   : > { %823 = vmatpush.bf16.msra.mxu1 %v1306_v9  ;;  %v654_v15 = vadd.f32 %v653_v11, %v652_v7  ;;  %v660_v16 = vadd.f32 %v659_v12, %v658_v8  ;;  %905 = vmatpush.bf16.msra.mxu2 %v1315_v31  ;;  %v1444_v50 = vld [vmem:[%s2207_s24] ss:$0 sm:$0xff] }
 0x127   : > { %v661_v19 = vpack.c.bf16 %v654_v15, %v654_v15  ;;  %v662_v20 = vpack.c.bf16 %v660_v16, %v660_v16 }
 0x128   : > { %741 = vmatpush.bf16.msra.mxu0 %v1297_v10 }
 0x129   : > { %824 = vmatpush.bf16.msra.mxu1 %v1305_v13  ;;  %v685_v23 = vunpack.c.l.b16 %v661_v19  ;;  %v686_v24 = vunpack.c.l.b16 %v662_v20  ;;  %906 = vmatpush.bf16.msra.mxu2 %v1314_v32 }
 0x12b   : > { %v687_v26 = vsel %vm545_vm0, %v686_v24, %v685_v23 }
 0x12c   : > { %742 = vmatpush.bf16.msra.mxu0 %v1296_v14  ;;  %v688_v27 = vpack.c.b16 %v687_v26, %v687_v26 }
 0x12d   : > { %825 = vmatpush.bf16.msra.mxu1 %v1304_v17  ;;  %907 = vmatpush.bf16.msra.mxu2 %v1313_v33 }
 0x130   : > { %743 = vmatpush.bf16.msra.mxu0 %v1295_v18 }
 0x131   : > { %826 = vmatpush.bf16.msra.mxu1 %v1303_v21  ;;  %908 = vmatpush.bf16.msra.mxu2 %v1312_v34 }
 0x134   : > { %744 = vmatpush.bf16.msra.mxu0 %v1294_v22 }
 0x135   : > { %827 = vmatpush.bf16.msra.mxu1 %v1302_v28  ;;  %909 = vmatpush.bf16.msra.mxu2 %v1311_v35 }
 0x138   : > { %745 = vmatpush.bf16.msra.mxu0 %v1293_v25 }
 0x139   : > { %828 = vmatpush.bf16.msra.mxu1 %v1301_v29  ;;  %910 = vmatpush.bf16.msra.mxu2 %v1310_v42 }
 0x13b   : > { %746 = vmatmul.bf16.vlgmr.msra.gmra.mxu0 %v688_v27 }
 0x13d   : > { %911 = vmatpush.bf16.msra.mxu2 %v1309_v43 }
 0x1b8   : > { %v747_v37 = vpop.f32.mrf.mxu0 }
 0x1b9   : > { %v748_v38 = vadd.f32 %v1442_v36, %v747_v37 }
 0x1bb   : > { %v751_v39 = vmax.f32 %v748_v38, 0.0 }
 0x1bd   : > { %v752_v40 = vpack.c.bf16 %v751_v39, %v751_v39 }
 0x1bf   : > { %829 = vmatmul.bf16.vlgmr.msra.gmra.mxu1 %v752_v40 }
 0x1c0   : > { %v749_v41 = vpop.f32.mrf.mxu0 }
 0x23c   : > { %v830_v45 = vpop.f32.mrf.mxu1 }
 0x23d   : > { %v831_v46 = vadd.f32 %v1443_v44, %v830_v45 }
 0x23f   : > { %v834_v47 = vmax.f32 %v831_v46, 0.0 }
 0x241   : > { %v835_v48 = vpack.c.bf16 %v834_v47, %v834_v47 }
 0x243   : > { %912 = vmatmul.bf16.vlgmr.msra.gmra.mxu2 %v835_v48 }
 0x244   : > { %v832_v49 = vpop.f32.mrf.mxu1 }
 0x2c6   : > { %v913_v51 = vpop.f32.mrf.mxu2 }
 0x2c7   : > { %v914_v52 = vadd.f32 %v1444_v50, %v913_v51 }
 0x2c9   : > { %917 = vst [vmem:[%s365_s2] sm:$0x3] %v914_v52 }
 0x2ce   : > { %v915_v53 = vpop.f32.mrf.mxu2 }
 0x2cf PF: > { %s2208_s11 = sld [smem:[#allocation34_spill]]  ;;  %s931_s18 = sshll.u32 %s365_s2, 4  ;;  %s932_s18 = int_to_ptr.vmem [resolvable:$true] %s931_s18 }
 0x2d0   : > { %s2210_s15 = sld [smem:[#allocation51_spill]]  ;;  %s919_s13 = scalar_lea.sflag [#allocation9], %s363_s9 }
 0x2d5   : > { %s1268_s28 = sshll.u32 %s2208_s11, 1 }
 0x2d6   : > { %s2211_s25 = smov %s2210_s15  ;;  %s929_s26 = scalar_lea.hbm %s2210_s15, %s1268_s28 }
 0x2d7   : > { %s933_s22 = sshll.u32 %s929_s26, 4  ;;  %s1667_s5 = scalar_lea.hbm %s2211_s25, 4  ;;  %s934_s22 = int_to_ptr.hbm [resolvable:$true] %s933_s22 }
 0x2d8   : > { %s1661_s0 = sshra.s32 %s934_s22, 4  ;;  %s1662_s0 = int_to_ptr.hbm [resolvable:$true] %s1661_s0 }
 0x2d9   : > { %s1663_s16 = scalar_lea.hbm %s1662_s0, 2  ;;  %p1668_p7 = scmp.lt.s32.totalorder %s1662_s0, %s2211_s25 }
 0x2da   : > { %p1664_p5 = scmp.ne.s32.totalorder %s1662_s0, %s1663_s16  ;;  %p1669_p8 = scmp.lt.s32.totalorder %s1667_s5, %s1663_s16 }
 0x2dc   : > { %p1665_p3 = pnand %p1664_p5, %p1938_p12  ;;  %p1670_p9 = por %p1669_p8, %p1668_p7 }
 0x2de   : > { %p1666_p6 = pneg %p1665_p3 }
 0x2e0   : > { %p1671_p10 = pnand %p1670_p9, %p1666_p6 }
 0x2e2   : > { %1674 = shalt.err (!%p1671_p10)
}
 0x2e3   : > { %1329 = dma.vmem_to_hbm [thread:$0]  (%p1938_p12), %s932_s18, 32, %s934_s22, %s919_s13  }
 0x2e4 PF: > { %s2212_s9 = sld [smem:[#allocation36_spill]] }
 0x2e5   : > { %s2213_s20 = sld [smem:[#allocation31_spill]] }
 0x2ea   : > { %p1347_p11 = scmp.ge.s32.totalorder %s2212_s9, 2 }
 0x2eb   : > { %s945_s4 = sand.u32 1, %s2213_s20  }
 0x2ec   : > { %p1342_p13 = pnand %p1347_p11, %p1948_p2  ;;  %s946_s6 = scalar_lea.sflag [#allocation9], %s945_s4 }
 0x2ee   : > { %p1343_p0 = pneg %p1342_p13 }
 0x2f0   : > { %1738 = dma.done.wait (%p1343_p0), %s946_s6, 32  }
 0x2f1   : > { %1740 = vsyncadd (%p1343_p0), %s946_s6, 4294967264  ;;  %s29_s23 = sadd.s32 1, %s2212_s9   ;;  %s2215_s24 = sld [smem:[#allocation32_spill]] }
 0x2f2   : > { %p26_p1 = scmp.ge.s32.totalorder %s29_s23, 8   ;;  %s2216_s15 = sld [smem:[#allocation40_spill]] }
 0x2f3   : > { %s2217_s11 = sld [smem:[#allocation33_spill]]  ;;  %s2222_s13 = smov %s1747_s14 }
 0x2f4   : > { %s2218_s18 = sld [smem:[#allocation39_spill]]  ;;  %s2224_s16 = smov %s1759_s17 }
 0x2f5   : > { %s2219_s20 = sld [smem:[#allocation35_spill]]  ;;  %s2226_s19 = smov %s1775_s21 }
 0x2f6   : > { %s2220_s30 = sld [smem:[#allocation37_spill]] }
 0x2f7   : > { %s2221_s22 = sld [smem:[#allocation38_spill]]  ;;  %s2223_s14 = smov %s2215_s24 }
 0x2f8   :  { %28 = sbr.rel (!%p26_p1) target bundleno = 21 (0x15), region = 147 }
 0x2f9   : > { %s2225_s17 = smov %s2217_s11 }
 0x2fc   : > { %s2227_s21 = smov %s2220_s30 }
 0x2fd   :  { %952 = vsyncpa [#allocation8], 1 }
 0x2fe   :  { %954 = vsyncpa [#allocation8 + $0x1], 1 }
 0x2ff   :  { %955 = vsyncpa [#allocation11], 1 }
 0x300   :  { %957 = vsyncpa [#allocation11 + $0x1], 1 }
 0x301   :  { %958 = vsyncpa [#allocation9], 1 }
 0x302   :  { %960 = vsyncpa [#allocation9 + $0x1], 1 }
 0x303   :  { %961 = vsyncmov [#allocation6] }
 0x306   :  { %s962_s28 = vpop.sfrf %961 }
 0x307   :  { %p1271_p12 = scmp.ne.s32.totalorder %s962_s28, 0 }
 0x309   :  { %966 = shalt.err (%p1271_p12)  }
 0x30a   :  { %968 = vsyncmov [#allocation6 + $0x1] }
 0x30d   :  { %s969_s10 = vpop.sfrf %968 }
 0x30e   :  { %p1272_p2 = scmp.ne.s32.totalorder %s969_s10, 0 }
 0x310   :  { %973 = shalt.err (%p1272_p2)  }
 0x311   :  { %975 = vsyncmov [#allocation6 + $0x2] }
 0x314   :  { %s976_s29 = vpop.sfrf %975 }
 0x315   :  { %p1273_p4 = scmp.ne.s32.totalorder %s976_s29, 0 }
 0x317   :  { %980 = shalt.err (%p1273_p4)  }
 0x318   :  { %982 = vsyncmov [#allocation6 + $0x3] }
 0x31b   :  { %s983_s23 = vpop.sfrf %982 }
 0x31c   :  { %p1274_p5 = scmp.ne.s32.totalorder %s983_s23, 0 }
 0x31e   :  { %987 = shalt.err (%p1274_p5)  }

</bundles_post_ra>
